<compile_context>
chip_gen: v7x
topology: tpu7x:2x2x1
jax: 0.10.0
libtpu: 0.0.40
codegen_flags: <defaults>
</compile_context>

<pallas_src>
import jax
import jax.numpy as jnp
from jax import lax
from jax.experimental import pallas as pl
from jax.experimental.pallas import tpu as pltpu


def _round_up(x, m):
    return (x + m - 1) // m * m


def _multilabel_embed_kernel(idx_ref, w_ref, o_ref, acc_ref):
    """One (batch-tile, vocab-tile) grid step.

    idx_ref : (TB, L)  int32    label ids for this batch tile
    w_ref   : (TV, E)  bfloat16 vocab slice of the embedding table
    o_ref   : (TB, E)  float32  output tile (resident across the vocab axis)
    acc_ref : (TB, E)  float32  VMEM accumulator scratch
    """
    k = pl.program_id(1)                       # vocab (reduction) step

    @pl.when(k == 0)
    def _():
        acc_ref[...] = jnp.zeros_like(acc_ref)

    idx = idx_ref[...]                         # (TB, L) int32
    tb, num_labels = idx.shape
    tv = w_ref.shape[0]

    # Global vocab ids covered by this vocab tile.
    vocab_ids = lax.broadcasted_iota(jnp.int32, (tb, tv), 1) + k * tv

    # counts[b, v] = #{l : idx[b, l] == v}, restricted to this vocab slice.
    # int32 accumulator, single cast to the matmul dtype at the end.
    counts = jnp.zeros((tb, tv), jnp.int32)
    for l in range(num_labels):                # L is static and tiny
        counts = counts + (idx[:, l:l + 1] == vocab_ids).astype(jnp.int32)
    multi_hot = counts.astype(jnp.bfloat16)    # counts <= L: exact in bf16

    # gather + sum over labels == counts @ table-slice  (bf16 MXU, f32 accum).
    acc_ref[...] += jnp.dot(multi_hot, w_ref[...],
                            preferred_element_type=jnp.float32)

    @pl.when(k == pl.num_programs(1) - 1)
    def _():
        o_ref[...] = acc_ref[...].astype(o_ref.dtype)


def multilabel_embedding(inputs, weight, *, batch_tile=None, vocab_tile=None):
    """inputs: (B, L) int labels, weight: (V, E) float32 -> (B, E) float32."""
    B, L = inputs.shape
    V, E = weight.shape

    # MXU-shaped batch tile; vocab tiled as a reduction axis.
    if batch_tile is None:
        batch_tile = min(_round_up(B, 8), 256)
    if vocab_tile is None:
        vocab_tile = min(_round_up(V, 128), 2048)

    # Pad to tile multiples; keep output lane dim a multiple of 128.
    Bp = _round_up(B, batch_tile)
    Vp = _round_up(V, vocab_tile)
    Ep = _round_up(E, 128)

    idx = inputs.astype(jnp.int32)
    if Bp != B:
        idx = jnp.pad(idx, ((0, Bp - B), (0, 0)))          # pads with id 0 (sliced off)
    w = weight.astype(jnp.bfloat16)                         # bf16 MXU operand
    if Vp != V or Ep != E:
        w = jnp.pad(w, ((0, Vp - V), (0, Ep - E)))          # zero rows/cols contribute 0

    grid = (Bp // batch_tile, Vp // vocab_tile)

    # Rough VMEM estimate (double-buffered blocks + scratch + multi-hot);
    # only raise the scoped limit when it is actually needed.
    est = (2 * (batch_tile * L * 4 + vocab_tile * Ep * 2 + batch_tile * Ep * 4)
           + batch_tile * Ep * 4 + batch_tile * vocab_tile * 4)
    vmem_limit = None
    if est > 24 * 1024 * 1024:
        vmem_limit = min(2 * est, 100 * 1024 * 1024)

    out = pl.pallas_call(
        _multilabel_embed_kernel,
        out_shape=jax.ShapeDtypeStruct((Bp, Ep), jnp.float32),
        grid_spec=pltpu.PrefetchScalarGridSpec(
            num_scalar_prefetch=0,
            grid=grid,
            in_specs=[
                pl.BlockSpec((batch_tile, L), lambda i, k: (i, 0)),    # label ids
                pl.BlockSpec((vocab_tile, Ep), lambda i, k: (k, 0)),   # table slice
            ],
            out_specs=pl.BlockSpec((batch_tile, Ep), lambda i, k: (i, 0)),
            scratch_shapes=[pltpu.VMEM((batch_tile, Ep), jnp.float32)],
        ),
        compiler_params=pltpu.CompilerParams(
            dimension_semantics=("parallel", "arbitrary"),
            vmem_limit_bytes=vmem_limit),
    )(idx, w)

    return out[:B, :E]


if __name__ == "__main__":
    # Small, module-consistent shapes.
    vocab_size = 512
    embed_size = 128
    batch = 16
    num_labels = 3        # fixed number of labels per data point

    key = jax.random.PRNGKey(0)
    k_w, k_idx = jax.random.split(key)

    # Deterministic parameter init matching the module's normal_(mean=0, std=...)
    std = 0.2745960056781769
    weight = (jax.random.normal(k_w, (vocab_size, embed_size), dtype=jnp.float32)
              * std)

    inputs = jax.random.randint(
        k_idx, (batch, num_labels), minval=0, maxval=vocab_size, dtype=jnp.int32)

    # Full batch as one (parallel) tile; vocab_tile=256 exercises the reduction
    # axis (grid = (1, 2)).
    out = multilabel_embedding(inputs, weight, batch_tile=16, vocab_tile=256)
    out = jax.block_until_ready(out)

    # References: the kernel feeds the MXU a bf16-quantized table (f32 accum),
    # so compare exactly against the bf16-rounded table and loosely against the
    # pure-f32 module semantics.
    w_q = weight.astype(jnp.bfloat16).astype(jnp.float32)
    ref_bf16 = w_q[inputs].sum(axis=-2)
    ref_f32 = weight[inputs].sum(axis=-2)

    assert out.shape == (batch, embed_size)
    assert jnp.allclose(out, ref_bf16, atol=1e-5, rtol=1e-5), "mismatch vs bf16-table reference"
    assert jnp.allclose(out, ref_f32, atol=2e-2, rtol=0.0), "bf16 quantization error out of bound"

    print("KERNEL_OK")
</pallas_src>

<mosaic_0001>
module attributes {stable_mosaic.version = 11 : i64} {
  func.func @_multilabel_embed_kernel(%arg0: i32, %arg1: i32, %arg2: memref<16x3xi32, #tpu.memory_space<vmem>>, %arg3: memref<256x128xbf16, #tpu.memory_space<vmem>>, %arg4: memref<16x128xf32, #tpu.memory_space<vmem>>, %arg5: memref<16x128xf32, #tpu.memory_space<vmem>>) attributes {dimension_semantics = [#tpu.dimension_semantics<parallel>, #tpu.dimension_semantics<arbitrary>], iteration_bounds = array<i64: 1, 2>, scalar_prefetch = 0 : i64, scratch_operands = 1 : i64, tpu.core_type = #tpu.core_type<tc>, window_params = [{transform_indices = @transform_0, window_bounds = array<i64: 16, 3>}, {transform_indices = @transform_1, window_bounds = array<i64: 256, 128>}, {transform_indices = @transform_2, window_bounds = array<i64: 16, 128>}]} {
    %c0_i32 = arith.constant 0 : i32
    %0 = arith.cmpi eq, %arg1, %c0_i32 : i32
    %1 = arith.extui %0 : i1 to i32
    %c0_i32_0 = arith.constant 0 : i32
    %2 = arith.cmpi ne, %1, %c0_i32_0 : i32
    scf.if %2 {
      %cst_10 = arith.constant 0.000000e+00 : f32
      %33 = vector.broadcast %cst_10 : f32 to vector<16x128xf32>
      %c0_11 = arith.constant 0 : index
      %c0_12 = arith.constant 0 : index
      %34 = vector.load %arg5[%c0_11, %c0_12] : memref<16x128xf32, #tpu.memory_space<vmem>>, vector<16x128xf32>
      tpu.vector_store %arg5[%c0_11, %c0_12], %33 {strides = array<i32>} : memref<16x128xf32, #tpu.memory_space<vmem>>, vector<16x128xf32>,
    } else {
    }
    %c0 = arith.constant 0 : index
    %c0_1 = arith.constant 0 : index
    %3 = vector.load %arg2[%c0, %c0_1] : memref<16x3xi32, #tpu.memory_space<vmem>>, vector<16x3xi32>
    %4 = tpu.iota {dimensions = array<i32: 1>} : vector<16x256xi32>
    %c256_i32 = arith.constant 256 : i32
    %5 = arith.muli %arg1, %c256_i32 : i32
    %6 = vector.broadcast %5 : i32 to vector<16x256xi32>
    %7 = arith.addi %4, %6 : vector<16x256xi32>
    %c0_i32_2 = arith.constant 0 : i32
    %8 = vector.broadcast %c0_i32_2 : i32 to vector<16x256xi32>
    %9 = vector.extract_strided_slice %3 {offsets = [0, 0], sizes = [16, 1], strides = [1, 1]} : vector<16x3xi32> to vector<16x1xi32>
    %10 = vector.broadcast %9 : vector<16x1xi32> to vector<16x256xi32>
    %11 = arith.cmpi eq, %10, %7 : vector<16x256xi32>
    %12 = arith.extui %11 : vector<16x256xi1> to vector<16x256xi32>
    %13 = arith.addi %8, %12 : vector<16x256xi32>
    %14 = vector.extract_strided_slice %3 {offsets = [0, 1], sizes = [16, 1], strides = [1, 1]} : vector<16x3xi32> to vector<16x1xi32>
    %15 = vector.broadcast %14 : vector<16x1xi32> to vector<16x256xi32>
    %16 = arith.cmpi eq, %15, %7 : vector<16x256xi32>
    %17 = arith.extui %16 : vector<16x256xi1> to vector<16x256xi32>
    %18 = arith.addi %13, %17 : vector<16x256xi32>
    %19 = vector.extract_strided_slice %3 {offsets = [0, 2], sizes = [16, 1], strides = [1, 1]} : vector<16x3xi32> to vector<16x1xi32>
    %20 = vector.broadcast %19 : vector<16x1xi32> to vector<16x256xi32>
    %21 = arith.cmpi eq, %20, %7 : vector<16x256xi32>
    %22 = arith.extui %21 : vector<16x256xi1> to vector<16x256xi32>
    %23 = arith.addi %18, %22 : vector<16x256xi32>
    %24 = arith.sitofp %23 : vector<16x256xi32> to vector<16x256xbf16>
    %c0_3 = arith.constant 0 : index
    %c0_4 = arith.constant 0 : index
    %25 = vector.load %arg5[%c0_3, %c0_4] : memref<16x128xf32, #tpu.memory_space<vmem>>, vector<16x128xf32>
    %c0_5 = arith.constant 0 : index
    %c0_6 = arith.constant 0 : index
    %26 = vector.load %arg3[%c0_5, %c0_6] : memref<256x128xbf16, #tpu.memory_space<vmem>>, vector<256x128xbf16>
    %cst = arith.constant dense<0.000000e+00> : vector<16x128xf32>
    %27 = tpu.matmul %24, %26, %cst {dimension_numbers = #tpu.dot_dimension_numbers<[1], [0], [0], [1], [0, 0, 1, 1], [], []>} : vector<16x256xbf16>, vector<256x128xbf16>, vector<16x128xf32> -> vector<16x128xf32>
    %28 = arith.addf %25, %27 : vector<16x128xf32>
    %c0_7 = arith.constant 0 : index
    %c0_8 = arith.constant 0 : index
    %29 = vector.load %arg5[%c0_7, %c0_8] : memref<16x128xf32, #tpu.memory_space<vmem>>, vector<16x128xf32>
    tpu.vector_store %arg5[%c0_7, %c0_8], %28 {strides = array<i32>} : memref<16x128xf32, #tpu.memory_space<vmem>>, vector<16x128xf32>,
    %c1_i32 = arith.constant 1 : i32
    %30 = arith.cmpi eq, %arg1, %c1_i32 : i32
    %31 = arith.extui %30 : i1 to i32
    %c0_i32_9 = arith.constant 0 : i32
    %32 = arith.cmpi ne, %31, %c0_i32_9 : i32
    scf.if %32 {
      %c0_10 = arith.constant 0 : index
      %c0_11 = arith.constant 0 : index
      %33 = vector.load %arg5[%c0_10, %c0_11] : memref<16x128xf32, #tpu.memory_space<vmem>>, vector<16x128xf32>
      %c0_12 = arith.constant 0 : index
      %c0_13 = arith.constant 0 : index
      %34 = vector.load %arg4[%c0_12, %c0_13] : memref<16x128xf32, #tpu.memory_space<vmem>>, vector<16x128xf32>
      tpu.vector_store %arg4[%c0_12, %c0_13], %33 {strides = array<i32>} : memref<16x128xf32, #tpu.memory_space<vmem>>, vector<16x128xf32>,
    } else {
    }
    return
  }
  func.func @transform_0(%arg0: i32, %arg1: i32) -> (i32, i32) {
    %c0_i32 = arith.constant 0 : i32
    %c0_i32_0 = arith.constant 0 : i32
    return %arg0, %c0_i32 : i32, i32
  }
  func.func @transform_1(%arg0: i32, %arg1: i32) -> (i32, i32) {
    %c0_i32 = arith.constant 0 : i32
    %c0_i32_0 = arith.constant 0 : i32
    return %arg1, %c0_i32 : i32, i32
  }
  func.func @transform_2(%arg0: i32, %arg1: i32) -> (i32, i32) {
    %c0_i32 = arith.constant 0 : i32
    %c0_i32_0 = arith.constant 0 : i32
    return %arg0, %c0_i32 : i32, i32
  }
}

</mosaic_0001>

<bundles_post_ra>
// kernel: tpu_custom_call.1
= control target key start
LH: loop header
LB: loop body
LE: loop exit
PB: predicated region body
PF: predicated region fallthrough
CT: control target
= control target key end

     0   :  { %7 = vsyncpa [#allocation4], 0  ;;  %s1005_s0 = inlined_call_operand.vmem [shape: s32[16,3], index: 0, kind: input, shape index: {}]   ;;  %s1006_s1 = inlined_call_operand.hbm [shape: bf16[512,128], index: 1, kind: input, shape index: {}]   ;;  %s1007_s2 = inlined_call_operand.hbm [shape: f32[16,128], index: 2, kind: output, shape index: {}]  }
   0x1   :  { %9 = vsyncpa [#allocation4 + $0x1], 0 }
   0x2   :  { %10 = vsyncpa [#allocation5], 0  ;;  %s816_s9 = smov 0   ;;  %s818_s10 = smov 0  }
   0x3   :  { %s820_s11 = smov 0   ;;  %s822_s12 = smov 0  }
   0x4   :  { %s824_s13 = smov 0   ;;  %s826_s14 = smov 0  }
   0x5 LB: > { %s534_s15 = sadd.s32 4294967295, %s789_s14   ;;  %s25_s16 = sadd.s32 1, %s785_s13  ;;  %s789_s14 = sphi %s826_s14, %s16_s14   ;;  %s785_s13 = sphi %s824_s13, %s1016_s13   ;;  %s781_s12 = sphi %s822_s12, %s1015_s12   ;;  %s777_s11 = sphi %s820_s11, %s1014_s11   ;;  %s773_s10 = sphi %s818_s10, %s1013_s10   ;;  %s769_s9 = sphi %s816_s9, %s1012_s9  }
   0x6   : > { %p26_p0 = scmp.ge.s32.totalorder %s25_s16, 2  ;;  %s61_s17 = sadd.s32 1, %s777_s11 }
   0x7   : > { %p68_p1 = scmp.ne.s32.totalorder %s777_s11, %s773_s10  ;;  %p69_p2 = scmp.eq.s32.totalorder %s789_s14, 0 }
   0x8   : > { %s1018_s16 = smov (%p26_p0, %s25_s16), 0  ;;  %p74_p4 = scmp.ne.s32.totalorder %s773_s10, %s769_s9 }
   0x9   : > { %p852_p3 = por %p69_p2, %p68_p1  ;;  %s58_s19 = ssub.s32 %s785_s13, %s1018_s16 }
   0xa   : > { %p75_p5 = scmp.eq.s32.totalorder %s534_s15, 0  ;;  %p59_p6 = scmp.eq.s32.totalorder %s58_s19, 0 }
   0xb   : > { %p599_p8 = scmp.lt.s32.totalorder %s789_s14, 2  ;;  %s133_s22 = sand.u32 1, %s777_s11  }
   0xc   : > { %p861_p7 = por %p75_p5, %p74_p4  ;;  %s566_s23 = sshll.u32 %s785_s13, 11 }
   0xd   : > { %s867_s21 = scalar_select %p59_p6, %s777_s11, %s61_s17  }
   0xe   : > { %s538_s24 = sshll.u32 %s133_s22, 7  ;;  %s874_s27 = scalar_lea.hbm %s1006_s1, %s566_s23 }
   0xf   : > { %s137_s28 = scalar_lea.vmem [#allocation3], %s538_s24  ;;  %p878_p9 = pnand %p599_p8, %p852_p3 }
  0x10   : > { %s144_s29 = sshll.u32 %s137_s28, 4  ;;  %s884_s3 = scalar_lea.sflag [#allocation4], %s133_s22  ;;  %s882_s29 = int_to_ptr.vmem [resolvable:$true] %s144_s29 }
  0x11   : > { %s679_s4 = scalar_lea.hbm %s874_s27, 2048  ;;  %p681_p11 = pneg %p878_p9 }
  0x12   : > { %p680_p10 = scmp.ne.s32.totalorder %s874_s27, %s679_s4  ;;  %s684_s7 = scalar_lea.hbm %s1006_s1, 4096 }
  0x13   : > { %p685_p0 = scmp.lt.u32.totalorder %s874_s27, %s1006_s1  ;;  %p686_p1 = scmp.lt.u32.totalorder %s684_s7, %s679_s4 }
  0x14   : > { %p682_p12 = pnand %p681_p11, %p680_p10  ;;  %p688_p3 = scmp.lt.u32.totalorder %s679_s4, %s874_s27 }
  0x15   : > { %p687_p2 = por %p686_p1, %p685_p0 }
  0x16   : > { %p683_p13 = pneg %p682_p12 }
  0x17   : > { %p689_p4 = por %p688_p3, %p687_p2 }
  0x19   : > { %p690_p5 = pnand %p689_p4, %p683_p13 }
  0x1b   : > { %693 = shalt.err (!%p690_p5)
}
  0x1c   : > { %s694_s17 = scalar_lea.vmem %s882_s29, 2048  ;;  %s791_s18 = smov [#allocation3]  }
  0x1d   : > { %p695_p6 = scmp.ne.s32.totalorder %s882_s29, %s694_s17  ;;  %s699_s19 = sshll.u32 %s791_s18, 4  ;;  %s700_s19 = int_to_ptr.vmem [resolvable:$false] %s699_s19 }
  0x1e   : > { %s701_s22 = scalar_lea.vmem %s700_s19, 4096  ;;  %p702_p12 = scmp.lt.s32.totalorder %s882_s29, %s700_s19 }
  0x1f   : > { %p697_p8 = pnand %p695_p6, %p681_p11  ;;  %p703_p0 = scmp.lt.s32.totalorder %s701_s22, %s694_s17 }
  0x21   : > { %p698_p10 = pneg %p697_p8  ;;  %p704_p1 = por %p703_p0, %p702_p12 }
  0x23   : > { %p705_p2 = pnand %p704_p1, %p698_p10 }
  0x25   : > { %708 = shalt.err (!%p705_p2)
}
  0x26   : > { %s792_s23 = smov 64   ;;  %s793_s24 = smov 4  }
  0x27   : > { %598 = dma.hbm_to_vmem [thread:$0]  (!%p878_p9), %s874_s27, 2048, %s882_s29, %s884_s3, %s792_s23, %s792_s23, %s793_s24  }
  0x28   : > { %p541_p11 = scmp.ge.s32.totalorder %s789_s14, 1  ;;  %p152_p13 = scmp.lt.s32.totalorder %s789_s14, 3 }
  0x2a   : > { %p153_p3 = pnand %p541_p11, %p152_p13 }
  0x2b   : > { %s158_s25 = sand.u32 (!%p153_p3), 1, %s773_s10  }
  0x2c   : > { %156 = sbr.rel (%p153_p3) target bundleno = 463 (0x1cf), region = 28  ;;  %s542_s26 = sshll.u32 (!%p153_p3), %s158_s25, 7 }
  0x2d   : > { %s159_s28 = scalar_lea.sflag (!%p153_p3), [#allocation4], %s158_s25  ;;  %s915_s4 = scalar_lea.vmem (!%p153_p3), [#allocation3], %s542_s26 }
  0x33   : > { %760 = dma.done.wait (%p861_p7), %s159_s28, 2048  }
  0x34   : > { %762 = vsyncadd (%p861_p7), %s159_s28, 4294965248  ;;  %p543_p4 = scmp.ne.s32.totalorder %s781_s12, 0 }
  0x35   : > { %v794_v0 = vmov (!%p543_p4), 0.0  }
  0x36   : > { %195 = sbr.rel (%p543_p4) target bundleno = 61 (0x3d), region = 36  ;;  %196 = vst [vmem:[#allocation2] sm:$0xff] (!%p543_p4), %v794_v0  ;;  %197 = vst [vmem:[#allocation2 + $0x8] sm:$0xff] (!%p543_p4), %v794_v0 }
  0x3d PF: > { %v198_v1 = vld [vmem:[%s1005_s0] sm:$0xff]  ;;  %v663_v2 = vld [vmem:[%s915_s4 + $0x40] sm:$0xff]   ;;  %v795_v3 = vmov 1   ;;  %v796_v4 = vmov 0   ;;  %v199_v5 = vld [vmem:[%s1005_s0 + $0x8] sm:$0xff]  ;;  %v797_v12 = vmov 2   ;;  %v200_v22 = vlaneseq }
  0x3e   : > { %660 = vset.pattern.permute.xlu1 %v795_v3  ;;  %659 = vset.pattern.permute.xlu0 %v796_v4  ;;  %v664_v6 = vld [vmem:[%s915_s4] sm:$0xff]   ;;  %v665_v7 = vld [vmem:[%s915_s4 + $0x48] sm:$0xff]   ;;  %v667_v9 = vld [vmem:[%s915_s4 + $0x50] sm:$0xff]   ;;  %s544_s3 = sshll.u32 %s781_s12, 8  ;;  %p561_p7 = scmp.ne.s32.totalorder %s781_s12, 1 }
  0x3f   : > { %222 = vperm.xlu1 %660, %v198_v1   ;;  %208 = vperm.xlu0 %659, %v198_v1   ;;  %v666_v8 = vld [vmem:[%s915_s4 + $0x8] sm:$0xff]   ;;  %v668_v10 = vld [vmem:[%s915_s4 + $0x10] sm:$0xff]   ;;  %v669_v11 = vld [vmem:[%s915_s4 + $0x58] sm:$0xff]   ;;  %v201_v23 = vand.u32 127, %v200_v22  ;;  %v204_v25 = vstv %s544_s3 }
  0x40   : > { %567 = vmatprep.subr.bf16.mxu0 %v663_v2  ;;  %v670_v13 = vld [vmem:[%s915_s4 + $0x18] sm:$0xff]   ;;  %v671_v14 = vld [vmem:[%s915_s4 + $0x60] sm:$0xff]   ;;  %v673_v16 = vld [vmem:[%s915_s4 + $0x68] sm:$0xff]  }
  0x41   : > { %568 = vmatpush3.bf16.msra.mxu0 %v664_v6  ;;  %v672_v15 = vld [vmem:[%s915_s4 + $0x20] sm:$0xff]   ;;  %v674_v17 = vld [vmem:[%s915_s4 + $0x28] sm:$0xff]   ;;  %v675_v18 = vld [vmem:[%s915_s4 + $0x70] sm:$0xff]   ;;  %v202_v24 = vadd.s32 128, %v201_v23  ;;  %v205_v26 = vadd.s32 %v204_v25, %v201_v23 }
  0x42   : > { %569 = vmatprep.subr.bf16.mxu0 %v665_v7  ;;  %v676_v19 = vld [vmem:[%s915_s4 + $0x30] sm:$0xff]   ;;  %v677_v20 = vld [vmem:[%s915_s4 + $0x78] sm:$0xff]  }
  0x43   : > { %225 = vperm.xlu1 %660, %v199_v5   ;;  %211 = vperm.xlu0 %659, %v199_v5   ;;  %v678_v21 = vld [vmem:[%s915_s4 + $0x38] sm:$0xff]   ;;  %v206_v27 = vadd.s32 %v204_v25, %v202_v24  ;;  %v263_v61 = vld [vmem:[#allocation2] sm:$0xff] }
  0x45   : > { %570 = vmatpush3.bf16.msra.mxu0 %v666_v8 }
  0x46   : > { %571 = vmatprep.subr.bf16.mxu0 %v667_v9 }
  0x47   : > { %662 = vset.pattern.permute.xlu1 %v797_v12  ;;  %661 = vset.pattern.permute.xlu0 %v797_v12 }
  0x48   : > { %243 = vperm.xlu1 %662, %v199_v5   ;;  %240 = vperm.xlu0 %661, %v198_v1   ;;  %v264_v1 = vld [vmem:[#allocation2 + $0x8] sm:$0xff] }
  0x49   : > { %572 = vmatpush3.bf16.msra.mxu0 %v668_v10 }
  0x4a   : > { %573 = vmatprep.subr.bf16.mxu0 %v669_v11 }
  0x4d   : > { %574 = vmatpush3.bf16.msra.mxu0 %v670_v13 }
  0x4e   : > { %575 = vmatprep.subr.bf16.mxu0 %v671_v14 }
  0x51   : > { %576 = vmatpush3.bf16.msra.mxu0 %v672_v15 }
  0x52   : > { %577 = vmatprep.subr.bf16.mxu0 %v673_v16 }
  0x55   : > { %578 = vmatpush3.bf16.msra.mxu0 %v674_v17 }
  0x56   : > { %579 = vmatprep.subr.bf16.mxu0 %v675_v18 }
  0x59   : > { %580 = vmatpush3.bf16.msra.mxu0 %v676_v19 }
  0x5a   : > { %581 = vmatprep.subr.bf16.mxu0 %v677_v20 }
  0x5d   : > { %582 = vmatpush3.bf16.msra.mxu0 %v678_v21 }
  0xbe   : > { %v223_v28 = vpop.permute.xlu1 %222  ;;  %v209_v29 = vpop.permute.xlu0 %208 }
  0xbf   : > { %vm227_vm0 = vcmp.eq.s32.totalorder %v223_v28, %v205_v26  ;;  %vm228_vm1 = vcmp.eq.s32.totalorder %v223_v28, %v206_v27  ;;  %vm213_vm2 = vcmp.eq.s32.totalorder %v209_v29, %v205_v26  ;;  %vm214_vm3 = vcmp.eq.s32.totalorder %v209_v29, %v206_v27 }
  0xc0   : > { %v231_v30 = vsel %vm227_vm0, 1, %v796_v4  ;;  %v232_v31 = vsel %vm228_vm1, 1, %v796_v4  ;;  %v217_v32 = vsel %vm213_vm2, 1, %v796_v4  ;;  %v218_v33 = vsel %vm214_vm3, 1, %v796_v4 }
  0xc1   : > { %v235_v40 = vadd.s32 %v231_v30, %v217_v32  ;;  %v236_v41 = vadd.s32 %v232_v31, %v218_v33 }
  0xc2   : > { %v226_v34 = vpop.permute.xlu1 %225  ;;  %v212_v35 = vpop.permute.xlu0 %211 }
  0xc3   : > { %vm229_vm4 = vcmp.eq.s32.totalorder %v226_v34, %v205_v26  ;;  %vm230_vm5 = vcmp.eq.s32.totalorder %v226_v34, %v206_v27  ;;  %vm215_vm6 = vcmp.eq.s32.totalorder %v212_v35, %v205_v26  ;;  %vm216_vm7 = vcmp.eq.s32.totalorder %v212_v35, %v206_v27 }
  0xc4   : > { %v233_v36 = vsel %vm229_vm4, 1, %v796_v4  ;;  %v234_v37 = vsel %vm230_vm5, 1, %v796_v4  ;;  %v219_v38 = vsel %vm215_vm6, 1, %v796_v4  ;;  %v220_v39 = vsel %vm216_vm7, 1, %v796_v4 }
  0xc5   : > { %v237_v42 = vadd.s32 %v233_v36, %v219_v38  ;;  %v238_v43 = vadd.s32 %v234_v37, %v220_v39 }
  0xc7   : > { %v244_v44 = vpop.permute.xlu1 %243  ;;  %v241_v45 = vpop.permute.xlu0 %240 }
  0xc8   : > { %vm247_vm8 = vcmp.eq.s32.totalorder %v244_v44, %v205_v26  ;;  %vm248_vm9 = vcmp.eq.s32.totalorder %v244_v44, %v206_v27  ;;  %vm245_vm10 = vcmp.eq.s32.totalorder %v241_v45, %v205_v26  ;;  %vm246_vm11 = vcmp.eq.s32.totalorder %v241_v45, %v206_v27 }
  0xc9   : > { %v251_v46 = vsel %vm247_vm8, 1, %v796_v4  ;;  %v252_v47 = vsel %vm248_vm9, 1, %v796_v4  ;;  %v249_v48 = vsel %vm245_vm10, 1, %v796_v4  ;;  %v250_v49 = vsel %vm246_vm11, 1, %v796_v4 }
  0xca   : > { %v255_v50 = vadd.s32 %v251_v46, %v237_v42  ;;  %v253_v51 = vadd.s32 %v249_v48, %v235_v40  ;;  %v254_v52 = vadd.s32 %v250_v49, %v236_v41  ;;  %v256_v53 = vadd.s32 %v252_v47, %v238_v43 }
  0xcc   : > { %v259_v54 = vcvt.s32.f32 %v255_v50  ;;  %v257_v55 = vcvt.s32.f32 %v253_v51  ;;  %v258_v56 = vcvt.s32.f32 %v254_v52  ;;  %v260_v57 = vcvt.s32.f32 %v256_v53 }
  0xce   : > { %v262_v58 = vpack.c.bf16 %v260_v57, %v258_v56  ;;  %v261_v59 = vpack.c.bf16 %v259_v54, %v257_v55 }
  0xd0   : > { %425 = vmatprep.mubr.bf16.mxu0 %v262_v58 }
  0xd1   : > { %426 = vmatmul.mubr.bf16.vlgmr.msra.gmra.mrb[0].mxu0 %v261_v59 }
 0x1a4   : > { %v583_v60 = vpop.f32.mrb[0].mxu0 }
 0x1a5   : > { %v584_v62 = vpop.f32.mrb[1].mxu0 }
 0x1a6   : > { %v585_v63 = vadd.f32 %v584_v62, %v583_v60  ;;  %v586_v0 = vpop.f32.mrb[2].mxu0  ;;  %441 = sbr.rel (%p561_p7) target bundleno = 437 (0x1b5), region = 40 }
 0x1a7   : > { %v587_v2 = vpop.f32.mrb[3].mxu0 }
 0x1a8   : > { %v434_v3 = vadd.f32 %v585_v63, %v263_v61  ;;  %v588_v4 = vadd.f32 %v587_v2, %v586_v0 }
 0x1aa   : > { %436 = vst [vmem:[#allocation2] sm:$0xff] %v434_v3  ;;  %v435_v5 = vadd.f32 %v588_v4, %v264_v1 }
 0x1ac   : > { %437 = vst [vmem:[#allocation2 + $0x8] sm:$0xff] %v435_v5 }
 0x1b1   : > { %v442_v6 = vld [vmem:[#allocation2] sm:$0xff] }
 0x1b2   : > { %444 = vst [vmem:[#allocation6] sm:$0xff] %v442_v6 }
 0x1b3   : > { %v443_v7 = vld [vmem:[#allocation2 + $0x8] sm:$0xff] }
 0x1b4   : > { %445 = vst [vmem:[#allocation6 + $0x8] sm:$0xff] %v443_v7 }
 0x1b5 PF: > { %p961_p9 = scmp.eq.s32.totalorder %s534_s15, 1  ;;  %s798_s6 = smov [#allocation6]  }
 0x1b6   : > { %s455_s7 = sshll.u32 %s798_s6, 4  ;;  %s456_s7 = int_to_ptr.vmem [resolvable:$true] %s455_s7 }
 0x1b7   : > { %s709_s8 = scalar_lea.vmem %s456_s7, 256  ;;  %p716_p10 = scmp.lt.s32.totalorder %s456_s7, %s456_s7 }
 0x1b8   : > { %p710_p5 = scmp.ne.s32.totalorder %s456_s7, %s709_s8  ;;  %p717_p12 = scmp.lt.s32.totalorder %s709_s8, %s709_s8 }
 0x1ba   : > { %p711_p6 = pnand %p710_p5, %p961_p9  ;;  %p718_p0 = por %p717_p12, %p716_p10 }
 0x1bc   : > { %p712_p8 = pneg %p711_p6 }
 0x1be   : > { %p719_p1 = pnand %p718_p0, %p712_p8 }
 0x1c0   : > { %722 = shalt.err (!%p719_p1)
}
 0x1c1   : > { %s723_s15 = scalar_lea.hbm %s1007_s2, 256 }
 0x1c2   : > { %p724_p2 = scmp.ne.s32.totalorder %s1007_s2, %s723_s15  ;;  %p729_p3 = scmp.lt.u32.totalorder %s723_s15, %s1007_s2 }
 0x1c4   : > { %p725_p11 = pnand %p724_p2, %p961_p9 }
 0x1c6   : > { %p726_p13 = pneg %p725_p11 }
 0x1c8   : > { %p731_p4 = pnand %p729_p3, %p726_p13 }
 0x1ca   : > { %734 = shalt.err (!%p731_p4)
}
 0x1cb   : > { %s799_s23 = smov 128   ;;  %s800_s24 = smov 8  }
 0x1cc   : > { %592 = dma.vmem_to_hbm [thread:$0]  (%p961_p9), %s456_s7, 256, %s1007_s2, [#allocation5], %s799_s23, %s799_s23, %s800_s24  }
 0x1cd   : > { %764 = dma.done.wait (%p961_p9), [#allocation5], 256  }
 0x1ce   : > { %766 = vsyncadd (%p961_p9), [#allocation5], 4294967040 }
 0x1cf PF: > { %s16_s14 = sadd.s32 1, %s789_s14   ;;  %s1012_s9 = smov %s773_s10 }
 0x1d0   : > { %p13_p7 = scmp.ge.s32.totalorder %s16_s14, 4   ;;  %s1013_s10 = smov %s777_s11 }
 0x1d1   : > { %s1014_s11 = smov %s867_s21  ;;  %s1015_s12 = smov %s785_s13 }
 0x1d2   : > { %s1016_s13 = smov %s1018_s16  ;;  %15 = sbr.rel (!%p13_p7) target bundleno = 5 (0x5), region = 77 }
 0x1d9   :  { %471 = vsyncpa [#allocation4], 1 }
 0x1da   :  { %473 = vsyncpa [#allocation4 + $0x1], 1 }
 0x1db   :  { %474 = vsyncpa [#allocation5], 1 }
 0x1dc   :  { %476 = vsyncpa [#allocation5 + $0x1], 1 }

</bundles_post_ra>
